<compile_context>
chip_gen: v7x
topology: tpu7x:2x2x1
jax: 0.10.0
libtpu: 0.0.40
codegen_flags: <defaults>
</compile_context>

<pallas_src>
import functools

import jax
import jax.numpy as jnp
from jax.experimental import pallas as pl
from jax.experimental.pallas import tpu as pltpu

_NEG_BIG = -1e30                      # pad value for logits: sigmoid -> 0, bce -> 0 exactly
_TARGET_BLOCK_BYTES = 2 * 1024 * 1024  # ~2 MiB per input block (per pipeline buffer)


def _round_up(x, m):
    return (x + m - 1) // m * m


def _loss_stats_kernel(p_ref, m_ref, o_ref, acc_ref):
    """Accumulate per-row BCE / Dice statistics over HW chunks.

    p_ref, m_ref : (ROW_TILE, HW_CHUNK) logits / target masks (input dtype)
    o_ref        : (ROW_TILE, 4) output [intersection, pred_sum, mask_sum, bce_sum]
    acc_ref      : (ROW_TILE, 4) f32 VMEM accumulator, resident across the HW axis
    """
    k = pl.program_id(1)

    @pl.when(k == 0)
    def _init():
        acc_ref[...] = jnp.zeros_like(acc_ref)

    x = p_ref[...].astype(jnp.float32)
    y = m_ref[...].astype(jnp.float32)

    # Share the single transcendental between sigmoid and BCE:
    #   e = exp(-|x|)
    #   sigmoid(x) = 1/(1+e)  if x >= 0 else e/(1+e)
    #   bce(x, y)  = max(x, 0) - x*y + log1p(e)   (== torch BCEWithLogitsLoss, stable)
    e = jnp.exp(-jnp.abs(x))
    r = 1.0 / (1.0 + e)
    s = jnp.where(x >= 0.0, r, e * r)
    bce = jnp.maximum(x, 0.0) - x * y + jnp.log1p(e)

    inter = jnp.sum(s * y, axis=1, keepdims=True)
    psum = jnp.sum(s, axis=1, keepdims=True)
    msum = jnp.sum(y, axis=1, keepdims=True)
    bsum = jnp.sum(bce, axis=1, keepdims=True)

    acc_ref[:, 0:1] += inter
    acc_ref[:, 1:2] += psum
    acc_ref[:, 2:3] += msum
    acc_ref[:, 3:4] += bsum

    @pl.when(k == pl.num_programs(1) - 1)
    def _finalize():
        # Single store of the whole (ROW_TILE, 4) stats block per row block.
        o_ref[...] = acc_ref[...]


@functools.partial(jax.jit, static_argnames=("bce_weight", "dice_weight", "smooth"))
def bce_dice_loss(preds, masks, bce_weight=0.5, dice_weight=0.5, smooth=1e-6):
    """Forward pass of BCEDiceLoss. preds/masks: (N, C, H, W) float arrays."""
    N, C, H, W = preds.shape
    NC, HW = N * C, H * W
    itemsize = jnp.dtype(preds.dtype).itemsize

    # ---- tiling: 2D grid = (row blocks, HW chunks) ----
    rows_padded = _round_up(NC, 8)
    row_tile = 8
    for cand in (256, 128, 64, 32, 16, 8):
        if rows_padded % cand == 0:
            row_tile = cand
            break

    hw_aligned = _round_up(HW, 128)
    target_lanes = max(128, (_TARGET_BLOCK_BYTES // (row_tile * itemsize)) // 128 * 128)
    hw_chunk = min(hw_aligned, target_lanes)
    hw_padded = _round_up(HW, hw_chunk)

    # No wrapper-side float32 cast: the kernel casts per block; inputs stream
    # through HBM in their native dtype.
    p2 = preds.reshape(NC, HW)
    m2 = masks.reshape(NC, HW)

    # Pad only when shapes are ragged. Padding the logits with a huge negative
    # value makes sigmoid == 0 and bce == 0 exactly, so padded lanes contribute
    # nothing; padded rows are sliced off before the final reductions.
    if rows_padded != NC or hw_padded != HW:
        p2 = jnp.pad(
            p2,
            ((0, rows_padded - NC), (0, hw_padded - HW)),
            constant_values=jnp.asarray(_NEG_BIG, preds.dtype),
        )
        m2 = jnp.pad(m2, ((0, rows_padded - NC), (0, hw_padded - HW)))

    grid = (rows_padded // row_tile, hw_padded // hw_chunk)

    total_elems = rows_padded * hw_padded
    cost = pl.CostEstimate(
        flops=10 * total_elems,
        transcendentals=3 * total_elems,
        bytes_accessed=2 * total_elems * itemsize + rows_padded * 4 * 4,
    )

    stats = pl.pallas_call(
        _loss_stats_kernel,
        out_shape=jax.ShapeDtypeStruct((rows_padded, 4), jnp.float32),
        grid=grid,
        in_specs=[
            pl.BlockSpec((row_tile, hw_chunk), lambda i, k: (i, k)),
            pl.BlockSpec((row_tile, hw_chunk), lambda i, k: (i, k)),
        ],
        out_specs=pl.BlockSpec((row_tile, 4), lambda i, k: (i, 0)),
        scratch_shapes=[pltpu.VMEM((row_tile, 4), jnp.float32)],
        compiler_params=pltpu.CompilerParams(
            dimension_semantics=("parallel", "arbitrary"),
        ),
        cost_estimate=cost,
    )(p2, m2)

    stats = stats[:NC]
    inter = stats[:, 0]
    psum = stats[:, 1]
    msum = stats[:, 2]
    bsum = stats[:, 3]

    # BCEWithLogitsLoss: mean over every (real) element.
    bce_loss = jnp.sum(bsum) / (NC * HW)

    # Dice: per (n, c) plane, then mean.
    dice = (2.0 * inter + smooth) / (psum + msum + smooth)
    dice_loss = 1.0 - jnp.mean(dice)

    return bce_weight * bce_loss + dice_weight * dice_loss


def _reference(preds, masks, bce_weight=0.5, dice_weight=0.5, smooth=1e-6):
    """Pure-JAX reference mirroring the PyTorch module."""
    x = preds.astype(jnp.float32)
    y = masks.astype(jnp.float32)
    bce = jnp.maximum(x, 0.0) - x * y + jnp.log1p(jnp.exp(-jnp.abs(x)))
    bce_loss = jnp.mean(bce)
    s = jax.nn.sigmoid(x)
    inter = jnp.sum(s * y, axis=(2, 3))
    dice = (2.0 * inter + smooth) / (
        jnp.sum(s, axis=(2, 3)) + jnp.sum(y, axis=(2, 3)) + smooth
    )
    dice_loss = 1.0 - jnp.mean(dice)
    return bce_weight * bce_loss + dice_weight * dice_loss


if __name__ == "__main__":
    key = jax.random.PRNGKey(0)
    k_pred, k_mask = jax.random.split(key)

    N, C, H, W = 2, 4, 16, 16
    preds = jax.random.normal(k_pred, (N, C, H, W), dtype=jnp.float32) * 2.0
    masks = (jax.random.uniform(k_mask, (N, C, H, W)) > 0.5).astype(jnp.float32)

    loss = bce_dice_loss(preds, masks)
    loss = jax.block_until_ready(loss)

    ref = _reference(preds, masks)
    assert jnp.allclose(loss, ref, atol=1e-5, rtol=1e-5), (loss, ref)

    print("KERNEL_OK")
</pallas_src>

<mosaic_0001>
module attributes {stable_mosaic.version = 11 : i64} {
  func.func @_loss_stats_kernel(%arg0: i32, %arg1: i32, %arg2: memref<8x256xf32, #tpu.memory_space<vmem>>, %arg3: memref<8x256xf32, #tpu.memory_space<vmem>>, %arg4: memref<8x4xf32, #tpu.memory_space<vmem>>, %arg5: memref<8x4xf32, #tpu.memory_space<vmem>>) attributes {dimension_semantics = [#tpu.dimension_semantics<parallel>, #tpu.dimension_semantics<arbitrary>], iteration_bounds = array<i64: 1, 1>, scalar_prefetch = 0 : i64, scratch_operands = 1 : i64, tpu.core_type = #tpu.core_type<tc>, window_params = [{transform_indices = @transform_0, window_bounds = array<i64: 8, 256>}, {transform_indices = @transform_1, window_bounds = array<i64: 8, 256>}, {transform_indices = @transform_2, window_bounds = array<i64: 8, 4>}]} {
    %c0_i32 = arith.constant 0 : i32
    %0 = arith.cmpi eq, %arg1, %c0_i32 : i32
    %1 = arith.extui %0 : i1 to i32
    %c0_i32_0 = arith.constant 0 : i32
    %2 = arith.cmpi ne, %1, %c0_i32_0 : i32
    scf.if %2 {
      %cst_27 = arith.constant 0.000000e+00 : f32
      %47 = vector.broadcast %cst_27 : f32 to vector<8x4xf32>
      %c0_28 = arith.constant 0 : index
      %c0_29 = arith.constant 0 : index
      %48 = vector.load %arg5[%c0_28, %c0_29] : memref<8x4xf32, #tpu.memory_space<vmem>>, vector<8x4xf32>
      tpu.vector_store %arg5[%c0_28, %c0_29], %47 {strides = array<i32>} : memref<8x4xf32, #tpu.memory_space<vmem>>, vector<8x4xf32>,
    } else {
    }
    %c0 = arith.constant 0 : index
    %c0_1 = arith.constant 0 : index
    %3 = vector.load %arg2[%c0, %c0_1] : memref<8x256xf32, #tpu.memory_space<vmem>>, vector<8x256xf32>
    %c0_2 = arith.constant 0 : index
    %c0_3 = arith.constant 0 : index
    %4 = vector.load %arg3[%c0_2, %c0_3] : memref<8x256xf32, #tpu.memory_space<vmem>>, vector<8x256xf32>
    %5 = math.absf %3 : vector<8x256xf32>
    %cst = arith.constant 0.000000e+00 : f32
    %6 = vector.broadcast %cst : f32 to vector<8x256xf32>
    %7 = arith.subf %6, %5 : vector<8x256xf32>
    %8 = math.exp %7 : vector<8x256xf32>
    %cst_4 = arith.constant 1.000000e+00 : f32
    %9 = vector.broadcast %cst_4 : f32 to vector<8x256xf32>
    %10 = arith.addf %9, %8 : vector<8x256xf32>
    %cst_5 = arith.constant 1.000000e+00 : f32
    %11 = vector.broadcast %cst_5 : f32 to vector<8x256xf32>
    %12 = arith.divf %11, %10 : vector<8x256xf32>
    %cst_6 = arith.constant 0.000000e+00 : f32
    %13 = vector.broadcast %cst_6 : f32 to vector<8x256xf32>
    %14 = arith.cmpf oge, %3, %13 : vector<8x256xf32>
    %15 = arith.mulf %8, %12 : vector<8x256xf32>
    %16 = arith.select %14, %12, %15 : vector<8x256xi1>, vector<8x256xf32>
    %cst_7 = arith.constant 0.000000e+00 : f32
    %17 = vector.broadcast %cst_7 : f32 to vector<8x256xf32>
    %18 = arith.maximumf %3, %17 : vector<8x256xf32>
    %19 = arith.mulf %3, %4 : vector<8x256xf32>
    %20 = arith.subf %18, %19 : vector<8x256xf32>
    %21 = math.log1p %8 : vector<8x256xf32>
    %22 = arith.addf %20, %21 : vector<8x256xf32>
    %23 = arith.mulf %16, %4 : vector<8x256xf32>
    %cst_8 = arith.constant dense<0.000000e+00> : vector<8xf32>
    %24 = vector.multi_reduction <add>, %23, %cst_8 [1] : vector<8x256xf32> to vector<8xf32>
    %25 = vector.shape_cast %24 : vector<8xf32> to vector<8x1xf32>
    %cst_9 = arith.constant dense<0.000000e+00> : vector<8xf32>
    %26 = vector.multi_reduction <add>, %16, %cst_9 [1] : vector<8x256xf32> to vector<8xf32>
    %27 = vector.shape_cast %26 : vector<8xf32> to vector<8x1xf32>
    %cst_10 = arith.constant dense<0.000000e+00> : vector<8xf32>
    %28 = vector.multi_reduction <add>, %4, %cst_10 [1] : vector<8x256xf32> to vector<8xf32>
    %29 = vector.shape_cast %28 : vector<8xf32> to vector<8x1xf32>
    %cst_11 = arith.constant dense<0.000000e+00> : vector<8xf32>
    %30 = vector.multi_reduction <add>, %22, %cst_11 [1] : vector<8x256xf32> to vector<8xf32>
    %31 = vector.shape_cast %30 : vector<8xf32> to vector<8x1xf32>
    %c0_12 = arith.constant 0 : index
    %c0_13 = arith.constant 0 : index
    %32 = vector.load %arg5[%c0_12, %c0_13] : memref<8x4xf32, #tpu.memory_space<vmem>>, vector<8x1xf32>
    %33 = arith.addf %32, %25 : vector<8x1xf32>
    %c0_14 = arith.constant 0 : index
    %c0_15 = arith.constant 0 : index
    %34 = vector.load %arg5[%c0_14, %c0_15] : memref<8x4xf32, #tpu.memory_space<vmem>>, vector<8x1xf32>
    tpu.vector_store %arg5[%c0_14, %c0_15], %33 {strides = array<i32>} : memref<8x4xf32, #tpu.memory_space<vmem>>, vector<8x1xf32>,
    %c0_16 = arith.constant 0 : index
    %c1 = arith.constant 1 : index
    %35 = vector.load %arg5[%c0_16, %c1] : memref<8x4xf32, #tpu.memory_space<vmem>>, vector<8x1xf32>
    %36 = arith.addf %35, %27 : vector<8x1xf32>
    %c0_17 = arith.constant 0 : index
    %c1_18 = arith.constant 1 : index
    %37 = vector.load %arg5[%c0_17, %c1_18] : memref<8x4xf32, #tpu.memory_space<vmem>>, vector<8x1xf32>
    tpu.vector_store %arg5[%c0_17, %c1_18], %36 {strides = array<i32>} : memref<8x4xf32, #tpu.memory_space<vmem>>, vector<8x1xf32>,
    %c0_19 = arith.constant 0 : index
    %c2 = arith.constant 2 : index
    %38 = vector.load %arg5[%c0_19, %c2] : memref<8x4xf32, #tpu.memory_space<vmem>>, vector<8x1xf32>
    %39 = arith.addf %38, %29 : vector<8x1xf32>
    %c0_20 = arith.constant 0 : index
    %c2_21 = arith.constant 2 : index
    %40 = vector.load %arg5[%c0_20, %c2_21] : memref<8x4xf32, #tpu.memory_space<vmem>>, vector<8x1xf32>
    tpu.vector_store %arg5[%c0_20, %c2_21], %39 {strides = array<i32>} : memref<8x4xf32, #tpu.memory_space<vmem>>, vector<8x1xf32>,
    %c0_22 = arith.constant 0 : index
    %c3 = arith.constant 3 : index
    %41 = vector.load %arg5[%c0_22, %c3] : memref<8x4xf32, #tpu.memory_space<vmem>>, vector<8x1xf32>
    %42 = arith.addf %41, %31 : vector<8x1xf32>
    %c0_23 = arith.constant 0 : index
    %c3_24 = arith.constant 3 : index
    %43 = vector.load %arg5[%c0_23, %c3_24] : memref<8x4xf32, #tpu.memory_space<vmem>>, vector<8x1xf32>
    tpu.vector_store %arg5[%c0_23, %c3_24], %42 {strides = array<i32>} : memref<8x4xf32, #tpu.memory_space<vmem>>, vector<8x1xf32>,
    %c0_i32_25 = arith.constant 0 : i32
    %44 = arith.cmpi eq, %arg1, %c0_i32_25 : i32
    %45 = arith.extui %44 : i1 to i32
    %c0_i32_26 = arith.constant 0 : i32
    %46 = arith.cmpi ne, %45, %c0_i32_26 : i32
    scf.if %46 {
      %c0_27 = arith.constant 0 : index
      %c0_28 = arith.constant 0 : index
      %47 = vector.load %arg5[%c0_27, %c0_28] : memref<8x4xf32, #tpu.memory_space<vmem>>, vector<8x4xf32>
      %c0_29 = arith.constant 0 : index
      %c0_30 = arith.constant 0 : index
      %48 = vector.load %arg4[%c0_29, %c0_30] : memref<8x4xf32, #tpu.memory_space<vmem>>, vector<8x4xf32>
      tpu.vector_store %arg4[%c0_29, %c0_30], %47 {strides = array<i32>} : memref<8x4xf32, #tpu.memory_space<vmem>>, vector<8x4xf32>,
    } else {
    }
    return
  }
  func.func @transform_0(%arg0: i32, %arg1: i32) -> (i32, i32) {
    %c0_i32 = arith.constant 0 : i32
    return %arg0, %arg1 : i32, i32
  }
  func.func @transform_1(%arg0: i32, %arg1: i32) -> (i32, i32) {
    %c0_i32 = arith.constant 0 : i32
    return %arg0, %arg1 : i32, i32
  }
  func.func @transform_2(%arg0: i32, %arg1: i32) -> (i32, i32) {
    %c0_i32 = arith.constant 0 : i32
    %c0_i32_0 = arith.constant 0 : i32
    return %arg0, %c0_i32 : i32, i32
  }
}

</mosaic_0001>

<bundles_post_ra>
// kernel: bce_dice_loss.1
= control target key start
LH: loop header
LB: loop body
LE: loop exit
PB: predicated region body
PF: predicated region fallthrough
CT: control target
= control target key end

     0   :  { %vm15_vm0 = vcmask 31744   ;;  %v120_v2 = vmov 0.0   ;;  %vm83_vm5 = vcmask 7168   ;;  %vm87_vm6 = vcmask 15368   ;;  %s153_s0 = inlined_call_operand.vmem [shape: f32[8,256], index: 0, kind: input, shape index: {}]   ;;  %s154_s1 = inlined_call_operand.vmem [shape: f32[8,256], index: 1, kind: input, shape index: {}]   ;;  %s155_s2 = inlined_call_operand.vmem [shape: f32[8,4], index: 2, kind: output, shape index: {}]  }
   0x1   :  { %v17_v0 = vld [vmem:[%s153_s0] sm:$0xff]  ;;  %v18_v1 = vld [vmem:[%s153_s0 + $0x8] sm:$0xff]  ;;  %16 = vst.msk [vmem:[#allocation2] sm:$0xff] %vm15_vm0, %v120_v2  ;;  %vm91_vm7 = vcmask 23568   ;;  %vm95_vm8 = vcmask 31768  }
   0x2   :  { %v19_v3 = vld [vmem:[%s154_s1] sm:$0xff]  ;;  %v20_v4 = vld [vmem:[%s154_s1 + $0x8] sm:$0xff]  ;;  %v21_v5 = vand.u32 2147483647, %v17_v0  ;;  %v22_v6 = vand.u32 2147483647, %v18_v1 }
   0x3   :  { %v75_v7 = vadd.f32 %v20_v4, %v19_v3  ;;  %v43_v19 = vmul.f32 %v19_v3, %v17_v0  ;;  %v41_v20 = vmax.f32 %v17_v0, 0.0  ;;  %v44_v23 = vmul.f32 %v20_v4, %v18_v1 }
   0x4   :  { %v23_v8 = vsub.f32 0.0, %v21_v5  ;;  %v24_v9 = vsub.f32 0.0, %v22_v6  ;;  %v42_v24 = vmax.f32 %v18_v1, 0.0  ;;  %vm35_vm1 = vcmp.ge.f32.partialorder %v17_v0, 0.0 }
   0x5   :  { %76 = vadd.xlane.f32.xlu1 %v75_v7  ;;  %vm36_vm2 = vcmp.ge.f32.partialorder %v18_v1, 0.0  ;;  %v45_v32 = vsub.f32 %v41_v20, %v43_v19 }
   0x6   :  { %v25_v10 = vmul.f32 1.442695, %v23_v8  ;;  %v27_v11 = vmul.f32 1.442695, %v24_v9  ;;  %v46_v36 = vsub.f32 %v42_v24, %v44_v23 }
   0x8   :  { %108 = vpow2.f32 %v25_v10  ;;  %v81_v49 = vld [vmem:[#allocation2] sm:$0xff] }
   0x9   :  { %110 = vpow2.f32 %v27_v11 }
  0x12   :  { %v109_v12 = vpop.eup %108 }
  0x13   :  { %v111_v13 = vpop.eup %110  ;;  %v29_v14 = vadd.f32 1.0, %v109_v12  ;;  %v50_v16 = vmul.f32 -0.5, %v109_v12  ;;  %v53_v21 = vand.u32 2147483647, %v109_v12 }
  0x14   :  { %v30_v15 = vadd.f32 1.0, %v111_v13  ;;  %v59_v17 = vmul.f32 -0.5, %v111_v13  ;;  %v62_v25 = vand.u32 2147483647, %v111_v13 }
  0x15   :  { %112 = vrcp.f32 %v29_v14  ;;  %v51_v18 = vadd.f32 1.0, %v50_v16  ;;  %vm54_vm3 = vcmp.lt.f32.partialorder %v53_v21, 0.0004427343 }
  0x16   :  { %114 = vrcp.f32 %v30_v15  ;;  %v60_v22 = vadd.f32 1.0, %v59_v17  ;;  %vm63_vm4 = vcmp.lt.f32.partialorder %v62_v25, 0.0004427343 }
  0x17   :  { %116 = vlog2.f32 %v29_v14  ;;  %v52_v29 = vmul.f32 %v109_v12, %v51_v18 }
  0x18   :  { %118 = vlog2.f32 %v30_v15  ;;  %v61_v33 = vmul.f32 %v111_v13, %v60_v22 }
  0x1f   :  { %v113_v26 = vpop.eup %112 }
  0x20   :  { %v115_v27 = vpop.eup %114  ;;  %v37_v28 = vmul.f32 %v113_v26, %v109_v12 }
  0x21   :  { %v117_v30 = vpop.eup %116  ;;  %v38_v31 = vmul.f32 %v115_v27, %v111_v13 }
  0x22   :  { %v119_v34 = vpop.eup %118  ;;  %v39_v35 = vsel %vm35_vm1, %v113_v26, %v37_v28  ;;  %v49_v37 = vmul.f32 0.6931472, %v117_v30 }
  0x23   :  { %v40_v38 = vsel %vm36_vm2, %v115_v27, %v38_v31  ;;  %v67_v39 = vmul.f32 %v39_v35, %v19_v3  ;;  %v58_v40 = vmul.f32 0.6931472, %v119_v34 }
  0x24   :  { %v68_v41 = vmul.f32 %v40_v38, %v20_v4  ;;  %v55_v42 = vsel %vm54_vm3, %v52_v29, %v49_v37  ;;  %v72_v47 = vadd.f32 %v40_v38, %v39_v35 }
  0x25   :  { %v64_v43 = vsel %vm63_vm4, %v61_v33, %v58_v40  ;;  %v65_v44 = vadd.f32 %v55_v42, %v45_v32 }
  0x26   :  { %v69_v45 = vadd.f32 %v68_v41, %v67_v39  ;;  %v66_v46 = vadd.f32 %v64_v43, %v46_v36 }
  0x28   :  { %70 = vadd.xlane.f32.xlu0 %v69_v45  ;;  %v78_v48 = vadd.f32 %v66_v46, %v65_v44 }
  0x2a   :  { %79 = vadd.xlane.f32.xlu1 %v78_v48 }
  0x2c   :  { %73 = vadd.xlane.f32.xlu0 %v72_v47 }
  0x92   :  { %v77_v55 = vpop.xlane.xlu1 %76 }
  0xb5   :  { %v71_v50 = vpop.xlane.xlu0 %70 }
  0xb6   :  { %v82_v51 = vadd.f32 %v81_v49, %v71_v50 }
  0xb7   :  { %v80_v58 = vpop.xlane.xlu1 %79 }
  0xb8   :  { %84 = vst.msk [vmem:[#allocation2] sm:$0xff] %vm83_vm5, %v82_v51 }
  0xb9   :  { %v74_v52 = vpop.xlane.xlu0 %73 }
  0xbf   :  { %v85_v53 = vld [vmem:[#allocation2] sm:$0xff] }
  0xc0   :  { %v86_v54 = vadd.f32 %v85_v53, %v74_v52 }
  0xc2   :  { %88 = vst.msk [vmem:[#allocation2] sm:$0xff] %vm87_vm6, %v86_v54 }
  0xc9   :  { %v89_v56 = vld [vmem:[#allocation2] sm:$0xff] }
  0xca   :  { %v90_v57 = vadd.f32 %v89_v56, %v77_v55 }
  0xcc   :  { %92 = vst.msk [vmem:[#allocation2] sm:$0xff] %vm91_vm7, %v90_v57 }
  0xd3   :  { %v93_v59 = vld [vmem:[#allocation2] sm:$0xff] }
  0xd4   :  { %v94_v60 = vadd.f32 %v93_v59, %v80_v58 }
  0xd6   :  { %96 = vst.msk [vmem:[#allocation2] sm:$0xff] %vm95_vm8, %v94_v60 }
  0xdd   :  { %v100_v61 = vld [vmem:[#allocation2] sm:$0xff] }
  0xde   :  { %102 = vst.msk [vmem:[%s155_s2] sm:$0xff] %vm15_vm0, %v100_v61 }

</bundles_post_ra>
